<compile_context>
chip_gen: v5e
topology: v5e:2x2
jax: 0.10.0
libtpu: 0.0.40
codegen_flags: <defaults>
</compile_context>

<pallas_src>
import jax
import jax.numpy as jnp
from jax.experimental import pallas as pl
from jax.experimental.pallas import tpu as pltpu


RELU_LEAK = 0.1
LANE = 128
SUBLANE = 8


def _round_up(x, m):
    return (x + m - 1) // m * m


# ----------------------------------------------------------------------------
# deterministic parameter construction (mirrors nn.Linear default init)
# ----------------------------------------------------------------------------
def _linear_init(key, n_in, n_out):
    kw, kb = jax.random.split(key)
    bound = 1.0 / float(n_in) ** 0.5
    W = jax.random.uniform(kw, (n_in, n_out), jnp.float32, -bound, bound)
    b = jax.random.uniform(kb, (n_out,), jnp.float32, -bound, bound)
    return W, b


def make_stage2vae_params(key, n_input, n_h_layers, n_h_units, n_latent):
    enc, n_inputs = [], []
    n_in = n_input
    for _ in range(n_h_layers):
        key, k = jax.random.split(key)
        enc.append(_linear_init(k, n_in, n_h_units))
        n_inputs.append(n_in)
        n_in = n_h_units
    key, km, ks = jax.random.split(key, 3)
    fc_mean = _linear_init(km, n_in, n_latent)
    fc_log_std = _linear_init(ks, n_in, n_latent)
    dec = []
    key, k = jax.random.split(key)
    dec.append(_linear_init(k, n_latent, n_in))
    for n_out in reversed(n_inputs):
        key, k = jax.random.split(key)
        dec.append(_linear_init(k, n_in, n_out))
        n_in = n_out
    return enc, fc_mean, fc_log_std, dec


# ----------------------------------------------------------------------------
# helpers
# ----------------------------------------------------------------------------
def _vmem_capacity_bytes():
    """Per-core VMEM capacity (trace-time query), with a conservative fallback."""
    try:
        info = pltpu.get_tpu_info()
        cap = getattr(info, "vmem_capacity_bytes", None)
        if cap:
            return int(cap)
    except Exception:
        pass
    return 64 << 20  # conservative: v7x per-TC capacity


def _const_block_spec(shape):
    """Constant-index (weight-resident) input spec with a single pipeline buffer.

    The index_map never changes, so Pallas never re-DMAs after step 0; a
    single buffer avoids holding two VMEM copies of every weight.
    """
    try:
        return pl.BlockSpec(shape, lambda i: (0, 0), pipeline_mode=pl.Buffered(1))
    except TypeError:  # older jax without pipeline_mode: fall back to default
        return pl.BlockSpec(shape, lambda i: (0, 0))


# ----------------------------------------------------------------------------
# Pallas forward (batch-gridded, weight-resident, lane-dense, bf16 operands)
# ----------------------------------------------------------------------------
def stage2vae_forward(x, eps, enc_params, fc_mean, fc_log_std, dec_params,
                      relu_leak=RELU_LEAK, block_batch=512):
    B, n_input = x.shape
    n_latent = eps.shape[1]
    n_out_final = dec_params[-1][0].shape[1]
    n_enc = len(enc_params)

    lat_pad = _round_up(n_latent, LANE)
    in_pad = _round_up(n_input, LANE)

    def pad_mat(W, rp, cp):
        return jnp.pad(W, ((0, rp - W.shape[0]), (0, cp - W.shape[1])))

    layer_ws, layer_bs, layer_out_pads = [], [], []

    # encoder layers
    cur = in_pad
    for (W, b) in enc_params:
        op = _round_up(W.shape[1], LANE)
        layer_ws.append(pad_mat(W, cur, op))
        layer_bs.append(jnp.pad(b, (0, op - b.shape[0])))
        layer_out_pads.append(op)
        cur = op
    enc_out_pad = cur

    # fused posterior head: columns [0, lat_pad) = means, [lat_pad, 2*lat_pad) = log_stds
    (Wm, bm), (Ws, bs) = fc_mean, fc_log_std
    Wh = jnp.zeros((enc_out_pad, 2 * lat_pad), jnp.float32)
    Wh = Wh.at[:Wm.shape[0], :n_latent].set(Wm)
    Wh = Wh.at[:Ws.shape[0], lat_pad:lat_pad + n_latent].set(Ws)
    bh = jnp.zeros((2 * lat_pad,), jnp.float32)
    bh = bh.at[:n_latent].set(bm).at[lat_pad:lat_pad + n_latent].set(bs)
    layer_ws.append(Wh)
    layer_bs.append(bh)
    layer_out_pads.append(2 * lat_pad)
    head_idx = len(layer_ws) - 1

    # decoder layers
    cur = lat_pad
    for (W, b) in dec_params:
        op = _round_up(W.shape[1], LANE)
        layer_ws.append(pad_mat(W, cur, op))
        layer_bs.append(jnp.pad(b, (0, op - b.shape[0])))
        layer_out_pads.append(op)
        cur = op
    out_final_pad = cur

    n_layers = len(layer_ws)

    # bf16 matmul operands, f32 accumulation (halves weight DMA + VMEM).
    layer_ws = [w.astype(jnp.bfloat16) for w in layer_ws]

    # pack all biases into one (n_layers_pad8, max_out_pad) f32 array
    n_layers_pad = _round_up(n_layers, SUBLANE)
    max_out_pad = max(layer_out_pads)
    bias_pack = jnp.zeros((n_layers_pad, max_out_pad), jnp.float32)
    for i, b in enumerate(layer_bs):
        bias_pack = bias_pack.at[i, :b.shape[0]].set(b)

    # batch tiling (sublane-aligned); ensure >=2 grid steps when possible so
    # the "parallel" axis shards across v7x's two TensorCores.
    TB = _round_up(min(block_batch, _round_up(B, SUBLANE)), SUBLANE)
    B_pad = _round_up(B, TB)
    if B_pad // TB == 1 and B_pad > SUBLANE:
        TB = _round_up(pl.cdiv(B_pad, 2), SUBLANE)
        B_pad = _round_up(B, TB)
    grid = (B_pad // TB,)

    # x shipped in bf16 (first matmul operand is bf16 anyway); eps stays f32.
    x_p = jnp.pad(x, ((0, B_pad - B), (0, in_pad - n_input))).astype(jnp.bfloat16)
    eps_p = jnp.pad(eps, ((0, B_pad - B), (0, lat_pad - n_latent)))

    def kernel(x_ref, eps_ref, *refs):
        w_refs = refs[:n_layers]
        bias_ref = refs[n_layers]
        out_ref, latpack_ref = refs[n_layers + 1:]

        def leaky(h):
            return jnp.where(h > 0, h, relu_leak * h)

        def dense(h, li):
            acc = jnp.dot(h.astype(jnp.bfloat16), w_refs[li][...],
                          preferred_element_type=jnp.float32)
            return acc + bias_ref[li:li + 1, :layer_out_pads[li]]

        # encoder
        h = x_ref[...]
        for li in range(n_enc):
            h = leaky(dense(h, li))

        # fused posterior head -> [means | log_stds] (static lane-aligned split)
        head = dense(h, head_idx)
        means = head[:, :lat_pad]
        log_stds = head[:, lat_pad:]

        # reparameterization (var_factor=1.0, post_factor=1.0) kept in f32
        lat = eps_ref[...] * jnp.exp(log_stds) + means

        # decoder (LeakyReLU after every Linear, including the last)
        d = lat
        for li in range(head_idx + 1, n_layers):
            d = leaky(dense(d, li))

        out_ref[...] = d
        # single wide store: [lat | means | log_stds]  (3 * lat_pad lanes)
        latpack_ref[...] = jnp.concatenate([lat, head], axis=1)

    in_specs = (
        [pl.BlockSpec((TB, in_pad), lambda i: (i, 0)),
         pl.BlockSpec((TB, lat_pad), lambda i: (i, 0))]
        + [_const_block_spec(w.shape) for w in layer_ws]
        + [_const_block_spec(bias_pack.shape)]
    )
    out_specs = (
        pl.BlockSpec((TB, out_final_pad), lambda i: (i, 0)),
        pl.BlockSpec((TB, 3 * lat_pad), lambda i: (i, 0)),
    )
    out_shape = (
        jax.ShapeDtypeStruct((B_pad, out_final_pad), jnp.float32),
        jax.ShapeDtypeStruct((B_pad, 3 * lat_pad), jnp.float32),
    )

    # ---- VMEM budget (generation-aware) -------------------------------------
    # Buffered(1) -> weights held once; batch tiles double-buffered by Pallas.
    w_bytes = sum(w.shape[0] * w.shape[1] * 2 for w in layer_ws)
    b_bytes = bias_pack.shape[0] * bias_pack.shape[1] * 4
    io_bytes = (2 * 2 * TB * in_pad            # x tile (bf16, double-buffered)
                + 2 * 4 * TB * lat_pad         # eps tile (f32)
                + 2 * 4 * TB * 3 * lat_pad     # packed latent output
                + 2 * 4 * TB * out_final_pad)  # decoder output
    act_bytes = 2 * 4 * TB * max_out_pad       # live f32 intermediates
    est = w_bytes + b_bytes + io_bytes + act_bytes

    vmem_cap = _vmem_capacity_bytes()
    if vmem_cap <= (64 << 20):
        # v7x: never request the full physical VMEM; leave Mosaic scratch headroom.
        cap = vmem_cap - (8 << 20)
    else:
        # v5e / v6e: allow well past 64 MiB when the resident weights need it.
        cap = min(vmem_cap - (16 << 20), 110 << 20)
    vmem_limit = int(min(max(est + (8 << 20), 32 << 20), cap))
    # TODO(synk): for very large n_h_units the resident bf16 weights can exceed
    # v7x's 64 MiB VMEM; a streaming fallback (tile the widest layer's N over a
    # second "arbitrary" grid axis / emit_pipeline) would be needed there.

    # advisory cost estimate so XLA overlaps pad/slice/eps ops with the call
    flops = 2 * B_pad * sum(w.shape[0] * w.shape[1] for w in layer_ws)
    bytes_accessed = (w_bytes + b_bytes
                      + B_pad * in_pad * 2          # x (bf16)
                      + B_pad * lat_pad * 4         # eps
                      + B_pad * (out_final_pad + 3 * lat_pad) * 4)
    cost = pl.CostEstimate(flops=flops,
                           transcendentals=B_pad * lat_pad,
                           bytes_accessed=bytes_accessed)

    out_p, latpack_p = pl.pallas_call(
        kernel,
        grid=grid,
        in_specs=in_specs,
        out_specs=out_specs,
        out_shape=out_shape,
        compiler_params=pltpu.CompilerParams(
            dimension_semantics=("parallel",),
            vmem_limit_bytes=vmem_limit),
        cost_estimate=cost,
    )(x_p, eps_p, *layer_ws, bias_pack)

    outputs = out_p[:B, :n_out_final]
    var_latents = latpack_p[:B, :n_latent]
    means = latpack_p[:B, lat_pad:lat_pad + n_latent]
    log_stds = latpack_p[:B, 2 * lat_pad:2 * lat_pad + n_latent]
    return outputs, var_latents, means, log_stds


# ----------------------------------------------------------------------------
# pure-JAX reference (matmul_dtype lets us match the kernel's bf16 operands)
# ----------------------------------------------------------------------------
def stage2vae_ref(x, eps, enc_params, fc_mean, fc_log_std, dec_params,
                  relu_leak=RELU_LEAK, matmul_dtype=jnp.float32):
    def dense(h, W, b):
        return jnp.dot(h.astype(matmul_dtype), W.astype(matmul_dtype),
                       preferred_element_type=jnp.float32) + b

    def leaky(h):
        return jnp.where(h > 0, h, relu_leak * h)

    h = x
    for W, b in enc_params:
        h = leaky(dense(h, W, b))
    means = dense(h, fc_mean[0], fc_mean[1])
    log_stds = dense(h, fc_log_std[0], fc_log_std[1])
    lat = eps * jnp.exp(log_stds) + means
    d = lat
    for W, b in dec_params:
        d = leaky(dense(d, W, b))
    return d, lat, means, log_stds


if __name__ == "__main__":
    # small, module-consistent config (production shapes just change these)
    batch = 8
    n_input = 32
    n_h_layers = 2
    n_h_units = 64
    n_latent = 16

    key = jax.random.PRNGKey(0)
    key, kp, kx, ke = jax.random.split(key, 4)
    enc_params, fc_mean, fc_log_std, dec_params = make_stage2vae_params(
        kp, n_input, n_h_layers, n_h_units, n_latent)

    x = jax.random.normal(kx, (batch, n_input), jnp.float32)
    # standard-normal noise for the reparameterization (torch.randn equivalent)
    eps = jax.random.normal(ke, (batch, n_latent), jnp.float32)

    outs = stage2vae_forward(x, eps, enc_params, fc_mean, fc_log_std, dec_params)
    outs = jax.block_until_ready(outs)

    refs_bf16 = stage2vae_ref(x, eps, enc_params, fc_mean, fc_log_std,
                              dec_params, matmul_dtype=jnp.bfloat16)
    refs_f32 = stage2vae_ref(x, eps, enc_params, fc_mean, fc_log_std,
                             dec_params, matmul_dtype=jnp.float32)
    for got, want_b, want_f in zip(outs, refs_bf16, refs_f32):
        assert got.shape == want_f.shape and got.dtype == jnp.float32
        # tight check against a reference with identical bf16-operand matmuls
        assert jnp.max(jnp.abs(got - want_b)) < 5e-3
        # loose sanity check against the full-f32 reference
        assert jnp.max(jnp.abs(got - want_f)) < 1e-1

    print("KERNEL_OK")
</pallas_src>

<mosaic_0001>
module attributes {stable_mosaic.version = 11 : i64} {
  func.func @kernel(%arg0: i32, %arg1: memref<8x128xbf16, #tpu.memory_space<vmem>>, %arg2: memref<8x128xf32, #tpu.memory_space<vmem>>, %arg3: memref<128x128xbf16, #tpu.memory_space<vmem>>, %arg4: memref<128x128xbf16, #tpu.memory_space<vmem>>, %arg5: memref<128x256xbf16, #tpu.memory_space<vmem>>, %arg6: memref<128x128xbf16, #tpu.memory_space<vmem>>, %arg7: memref<128x128xbf16, #tpu.memory_space<vmem>>, %arg8: memref<128x128xbf16, #tpu.memory_space<vmem>>, %arg9: memref<8x256xf32, #tpu.memory_space<vmem>>, %arg10: memref<8x128xf32, #tpu.memory_space<vmem>>, %arg11: memref<8x384xf32, #tpu.memory_space<vmem>>) attributes {dimension_semantics = [#tpu.dimension_semantics<parallel>], iteration_bounds = array<i64: 1>, scalar_prefetch = 0 : i64, scratch_operands = 0 : i64, tpu.core_type = #tpu.core_type<tc>, window_params = [{transform_indices = @transform_0, window_bounds = array<i64: 8, 128>}, {transform_indices = @transform_1, window_bounds = array<i64: 8, 128>}, {pipeline_mode = #tpu.pipeline_mode<synchronous>, transform_indices = @transform_2, window_bounds = array<i64: 128, 128>}, {pipeline_mode = #tpu.pipeline_mode<synchronous>, transform_indices = @transform_3, window_bounds = array<i64: 128, 128>}, {pipeline_mode = #tpu.pipeline_mode<synchronous>, transform_indices = @transform_4, window_bounds = array<i64: 128, 256>}, {pipeline_mode = #tpu.pipeline_mode<synchronous>, transform_indices = @transform_5, window_bounds = array<i64: 128, 128>}, {pipeline_mode = #tpu.pipeline_mode<synchronous>, transform_indices = @transform_6, window_bounds = array<i64: 128, 128>}, {pipeline_mode = #tpu.pipeline_mode<synchronous>, transform_indices = @transform_7, window_bounds = array<i64: 128, 128>}, {pipeline_mode = #tpu.pipeline_mode<synchronous>, transform_indices = @transform_8, window_bounds = array<i64: 8, 256>}, {transform_indices = @transform_9, window_bounds = array<i64: 8, 128>}, {transform_indices = @transform_10, window_bounds = array<i64: 8, 384>}]} {
    %c0 = arith.constant 0 : index
    %c0_0 = arith.constant 0 : index
    %0 = vector.load %arg1[%c0, %c0_0] : memref<8x128xbf16, #tpu.memory_space<vmem>>, vector<8x128xbf16>
    %c0_1 = arith.constant 0 : index
    %c0_2 = arith.constant 0 : index
    %1 = vector.load %arg3[%c0_1, %c0_2] : memref<128x128xbf16, #tpu.memory_space<vmem>>, vector<128x128xbf16>
    %cst = arith.constant dense<0.000000e+00> : vector<8x128xf32>
    %2 = tpu.matmul %0, %1, %cst {dimension_numbers = #tpu.dot_dimension_numbers<[1], [0], [0], [1], [0, 0, 1, 1], [], []>} : vector<8x128xbf16>, vector<128x128xbf16>, vector<8x128xf32> -> vector<8x128xf32>
    %c0_3 = arith.constant 0 : index
    %c0_4 = arith.constant 0 : index
    %3 = vector.load %arg9[%c0_3, %c0_4] : memref<8x256xf32, #tpu.memory_space<vmem>>, vector<1x128xf32>
    %4 = vector.broadcast %3 : vector<1x128xf32> to vector<8x128xf32>
    %5 = arith.addf %2, %4 : vector<8x128xf32>
    %cst_5 = arith.constant 0.000000e+00 : f32
    %6 = vector.broadcast %cst_5 : f32 to vector<8x128xf32>
    %7 = arith.cmpf ogt, %5, %6 : vector<8x128xf32>
    %cst_6 = arith.constant 1.000000e-01 : f32
    %8 = vector.broadcast %cst_6 : f32 to vector<8x128xf32>
    %9 = arith.mulf %8, %5 : vector<8x128xf32>
    %10 = arith.select %7, %5, %9 : vector<8x128xi1>, vector<8x128xf32>
    %11 = arith.truncf %10 : vector<8x128xf32> to vector<8x128xbf16>
    %c0_7 = arith.constant 0 : index
    %c0_8 = arith.constant 0 : index
    %12 = vector.load %arg4[%c0_7, %c0_8] : memref<128x128xbf16, #tpu.memory_space<vmem>>, vector<128x128xbf16>
    %cst_9 = arith.constant dense<0.000000e+00> : vector<8x128xf32>
    %13 = tpu.matmul %11, %12, %cst_9 {dimension_numbers = #tpu.dot_dimension_numbers<[1], [0], [0], [1], [0, 0, 1, 1], [], []>} : vector<8x128xbf16>, vector<128x128xbf16>, vector<8x128xf32> -> vector<8x128xf32>
    %c1 = arith.constant 1 : index
    %c0_10 = arith.constant 0 : index
    %14 = vector.load %arg9[%c1, %c0_10] : memref<8x256xf32, #tpu.memory_space<vmem>>, vector<1x128xf32>
    %15 = vector.broadcast %14 : vector<1x128xf32> to vector<8x128xf32>
    %16 = arith.addf %13, %15 : vector<8x128xf32>
    %cst_11 = arith.constant 0.000000e+00 : f32
    %17 = vector.broadcast %cst_11 : f32 to vector<8x128xf32>
    %18 = arith.cmpf ogt, %16, %17 : vector<8x128xf32>
    %cst_12 = arith.constant 1.000000e-01 : f32
    %19 = vector.broadcast %cst_12 : f32 to vector<8x128xf32>
    %20 = arith.mulf %19, %16 : vector<8x128xf32>
    %21 = arith.select %18, %16, %20 : vector<8x128xi1>, vector<8x128xf32>
    %22 = arith.truncf %21 : vector<8x128xf32> to vector<8x128xbf16>
    %c0_13 = arith.constant 0 : index
    %c0_14 = arith.constant 0 : index
    %23 = vector.load %arg5[%c0_13, %c0_14] : memref<128x256xbf16, #tpu.memory_space<vmem>>, vector<128x256xbf16>
    %cst_15 = arith.constant dense<0.000000e+00> : vector<8x256xf32>
    %24 = tpu.matmul %22, %23, %cst_15 {dimension_numbers = #tpu.dot_dimension_numbers<[1], [0], [0], [1], [0, 0, 1, 1], [], []>} : vector<8x128xbf16>, vector<128x256xbf16>, vector<8x256xf32> -> vector<8x256xf32>
    %c2 = arith.constant 2 : index
    %c0_16 = arith.constant 0 : index
    %25 = vector.load %arg9[%c2, %c0_16] : memref<8x256xf32, #tpu.memory_space<vmem>>, vector<1x256xf32>
    %26 = vector.broadcast %25 : vector<1x256xf32> to vector<8x256xf32>
    %27 = arith.addf %24, %26 : vector<8x256xf32>
    %28 = vector.extract_strided_slice %27 {offsets = [0, 0], sizes = [8, 128], strides = [1, 1]} : vector<8x256xf32> to vector<8x128xf32>
    %29 = vector.extract_strided_slice %27 {offsets = [0, 128], sizes = [8, 128], strides = [1, 1]} : vector<8x256xf32> to vector<8x128xf32>
    %c0_17 = arith.constant 0 : index
    %c0_18 = arith.constant 0 : index
    %30 = vector.load %arg2[%c0_17, %c0_18] : memref<8x128xf32, #tpu.memory_space<vmem>>, vector<8x128xf32>
    %31 = math.exp %29 : vector<8x128xf32>
    %32 = arith.mulf %30, %31 : vector<8x128xf32>
    %33 = arith.addf %32, %28 : vector<8x128xf32>
    %34 = arith.truncf %33 : vector<8x128xf32> to vector<8x128xbf16>
    %c0_19 = arith.constant 0 : index
    %c0_20 = arith.constant 0 : index
    %35 = vector.load %arg6[%c0_19, %c0_20] : memref<128x128xbf16, #tpu.memory_space<vmem>>, vector<128x128xbf16>
    %cst_21 = arith.constant dense<0.000000e+00> : vector<8x128xf32>
    %36 = tpu.matmul %34, %35, %cst_21 {dimension_numbers = #tpu.dot_dimension_numbers<[1], [0], [0], [1], [0, 0, 1, 1], [], []>} : vector<8x128xbf16>, vector<128x128xbf16>, vector<8x128xf32> -> vector<8x128xf32>
    %c3 = arith.constant 3 : index
    %c0_22 = arith.constant 0 : index
    %37 = vector.load %arg9[%c3, %c0_22] : memref<8x256xf32, #tpu.memory_space<vmem>>, vector<1x128xf32>
    %38 = vector.broadcast %37 : vector<1x128xf32> to vector<8x128xf32>
    %39 = arith.addf %36, %38 : vector<8x128xf32>
    %cst_23 = arith.constant 0.000000e+00 : f32
    %40 = vector.broadcast %cst_23 : f32 to vector<8x128xf32>
    %41 = arith.cmpf ogt, %39, %40 : vector<8x128xf32>
    %cst_24 = arith.constant 1.000000e-01 : f32
    %42 = vector.broadcast %cst_24 : f32 to vector<8x128xf32>
    %43 = arith.mulf %42, %39 : vector<8x128xf32>
    %44 = arith.select %41, %39, %43 : vector<8x128xi1>, vector<8x128xf32>
    %45 = arith.truncf %44 : vector<8x128xf32> to vector<8x128xbf16>
    %c0_25 = arith.constant 0 : index
    %c0_26 = arith.constant 0 : index
    %46 = vector.load %arg7[%c0_25, %c0_26] : memref<128x128xbf16, #tpu.memory_space<vmem>>, vector<128x128xbf16>
    %cst_27 = arith.constant dense<0.000000e+00> : vector<8x128xf32>
    %47 = tpu.matmul %45, %46, %cst_27 {dimension_numbers = #tpu.dot_dimension_numbers<[1], [0], [0], [1], [0, 0, 1, 1], [], []>} : vector<8x128xbf16>, vector<128x128xbf16>, vector<8x128xf32> -> vector<8x128xf32>
    %c4 = arith.constant 4 : index
    %c0_28 = arith.constant 0 : index
    %48 = vector.load %arg9[%c4, %c0_28] : memref<8x256xf32, #tpu.memory_space<vmem>>, vector<1x128xf32>
    %49 = vector.broadcast %48 : vector<1x128xf32> to vector<8x128xf32>
    %50 = arith.addf %47, %49 : vector<8x128xf32>
    %cst_29 = arith.constant 0.000000e+00 : f32
    %51 = vector.broadcast %cst_29 : f32 to vector<8x128xf32>
    %52 = arith.cmpf ogt, %50, %51 : vector<8x128xf32>
    %cst_30 = arith.constant 1.000000e-01 : f32
    %53 = vector.broadcast %cst_30 : f32 to vector<8x128xf32>
    %54 = arith.mulf %53, %50 : vector<8x128xf32>
    %55 = arith.select %52, %50, %54 : vector<8x128xi1>, vector<8x128xf32>
    %56 = arith.truncf %55 : vector<8x128xf32> to vector<8x128xbf16>
    %c0_31 = arith.constant 0 : index
    %c0_32 = arith.constant 0 : index
    %57 = vector.load %arg8[%c0_31, %c0_32] : memref<128x128xbf16, #tpu.memory_space<vmem>>, vector<128x128xbf16>
    %cst_33 = arith.constant dense<0.000000e+00> : vector<8x128xf32>
    %58 = tpu.matmul %56, %57, %cst_33 {dimension_numbers = #tpu.dot_dimension_numbers<[1], [0], [0], [1], [0, 0, 1, 1], [], []>} : vector<8x128xbf16>, vector<128x128xbf16>, vector<8x128xf32> -> vector<8x128xf32>
    %c5 = arith.constant 5 : index
    %c0_34 = arith.constant 0 : index
    %59 = vector.load %arg9[%c5, %c0_34] : memref<8x256xf32, #tpu.memory_space<vmem>>, vector<1x128xf32>
    %60 = vector.broadcast %59 : vector<1x128xf32> to vector<8x128xf32>
    %61 = arith.addf %58, %60 : vector<8x128xf32>
    %cst_35 = arith.constant 0.000000e+00 : f32
    %62 = vector.broadcast %cst_35 : f32 to vector<8x128xf32>
    %63 = arith.cmpf ogt, %61, %62 : vector<8x128xf32>
    %cst_36 = arith.constant 1.000000e-01 : f32
    %64 = vector.broadcast %cst_36 : f32 to vector<8x128xf32>
    %65 = arith.mulf %64, %61 : vector<8x128xf32>
    %66 = arith.select %63, %61, %65 : vector<8x128xi1>, vector<8x128xf32>
    %c0_37 = arith.constant 0 : index
    %c0_38 = arith.constant 0 : index
    %67 = vector.load %arg10[%c0_37, %c0_38] : memref<8x128xf32, #tpu.memory_space<vmem>>, vector<8x128xf32>
    tpu.vector_store %arg10[%c0_37, %c0_38], %66 {strides = array<i32>} : memref<8x128xf32, #tpu.memory_space<vmem>>, vector<8x128xf32>,
    %68 = tpu.concatenate %33, %27 in 1 : vector<8x128xf32>, vector<8x256xf32> -> vector<8x384xf32>
    %c0_39 = arith.constant 0 : index
    %c0_40 = arith.constant 0 : index
    %69 = vector.load %arg11[%c0_39, %c0_40] : memref<8x384xf32, #tpu.memory_space<vmem>>, vector<8x384xf32>
    tpu.vector_store %arg11[%c0_39, %c0_40], %68 {strides = array<i32>} : memref<8x384xf32, #tpu.memory_space<vmem>>, vector<8x384xf32>,
    return
  }
  func.func @transform_0(%arg0: i32) -> (i32, i32) {
    %c0_i32 = arith.constant 0 : i32
    %c0_i32_0 = arith.constant 0 : i32
    return %arg0, %c0_i32 : i32, i32
  }
  func.func @transform_1(%arg0: i32) -> (i32, i32) {
    %c0_i32 = arith.constant 0 : i32
    %c0_i32_0 = arith.constant 0 : i32
    return %arg0, %c0_i32 : i32, i32
  }
  func.func @transform_2(%arg0: i32) -> (i32, i32) {
    %c0_i32 = arith.constant 0 : i32
    %c0_i32_0 = arith.constant 0 : i32
    %c0_i32_1 = arith.constant 0 : i32
    return %c0_i32, %c0_i32_0 : i32, i32
  }
  func.func @transform_3(%arg0: i32) -> (i32, i32) {
    %c0_i32 = arith.constant 0 : i32
    %c0_i32_0 = arith.constant 0 : i32
    %c0_i32_1 = arith.constant 0 : i32
    return %c0_i32, %c0_i32_0 : i32, i32
  }
  func.func @transform_4(%arg0: i32) -> (i32, i32) {
    %c0_i32 = arith.constant 0 : i32
    %c0_i32_0 = arith.constant 0 : i32
    %c0_i32_1 = arith.constant 0 : i32
    return %c0_i32, %c0_i32_0 : i32, i32
  }
  func.func @transform_5(%arg0: i32) -> (i32, i32) {
    %c0_i32 = arith.constant 0 : i32
    %c0_i32_0 = arith.constant 0 : i32
    %c0_i32_1 = arith.constant 0 : i32
    return %c0_i32, %c0_i32_0 : i32, i32
  }
  func.func @transform_6(%arg0: i32) -> (i32, i32) {
    %c0_i32 = arith.constant 0 : i32
    %c0_i32_0 = arith.constant 0 : i32
    %c0_i32_1 = arith.constant 0 : i32
    return %c0_i32, %c0_i32_0 : i32, i32
  }
  func.func @transform_7(%arg0: i32) -> (i32, i32) {
    %c0_i32 = arith.constant 0 : i32
    %c0_i32_0 = arith.constant 0 : i32
    %c0_i32_1 = arith.constant 0 : i32
    return %c0_i32, %c0_i32_0 : i32, i32
  }
  func.func @transform_8(%arg0: i32) -> (i32, i32) {
    %c0_i32 = arith.constant 0 : i32
    %c0_i32_0 = arith.constant 0 : i32
    %c0_i32_1 = arith.constant 0 : i32
    return %c0_i32, %c0_i32_0 : i32, i32
  }
  func.func @transform_9(%arg0: i32) -> (i32, i32) {
    %c0_i32 = arith.constant 0 : i32
    %c0_i32_0 = arith.constant 0 : i32
    return %arg0, %c0_i32 : i32, i32
  }
  func.func @transform_10(%arg0: i32) -> (i32, i32) {
    %c0_i32 = arith.constant 0 : i32
    %c0_i32_0 = arith.constant 0 : i32
    return %arg0, %c0_i32 : i32, i32
  }
}

</mosaic_0001>

<bundles_post_ra>
// kernel: tpu_custom_call.1
= control target key start
LH: loop header
LB: loop body
LE: loop exit
PB: predicated region body
PF: predicated region fallthrough
CT: control target
= control target key end

     0   :  { %16 = vsyncpa [#allocation3], 0  ;;  %s1449_s0 = inlined_call_operand.hbm [shape: bf16[8,128], index: 0, kind: input, shape index: {}]   ;;  %s1450_s1 = inlined_call_operand.hbm [shape: f32[8,128], index: 1, kind: input, shape index: {}]   ;;  %s1451_s2 = inlined_call_operand.hbm [shape: bf16[128,128], index: 2, kind: input, shape index: {}]   ;;  %s1452_s3 = inlined_call_operand.hbm [shape: bf16[128,128], index: 3, kind: input, shape index: {}]   ;;  %s1453_s4 = inlined_call_operand.hbm [shape: bf16[128,256], index: 4, kind: input, shape index: {}]   ;;  %s1454_s5 = inlined_call_operand.hbm [shape: bf16[128,128], index: 5, kind: input, shape index: {}]   ;;  %s1455_s6 = inlined_call_operand.hbm [shape: bf16[128,128], index: 6, kind: input, shape index: {}]   ;;  %s1456_s7 = inlined_call_operand.hbm [shape: bf16[128,128], index: 7, kind: input, shape index: {}]   ;;  %s1457_s8 = inlined_call_operand.hbm [shape: f32[8,256], index: 8, kind: input, shape index: {}]   ;;  %s1458_s9 = inlined_call_operand.hbm [shape: f32[8,128], index: 9, kind: output, shape index: {0}]   ;;  %s1459_s10 = inlined_call_operand.hbm [shape: f32[8,384], index: 10, kind: output, shape index: {1}]  }
   0x1   :  { %17 = vsyncpa [#allocation6], 0 }
   0x2   :  { %18 = vsyncpa [#allocation9], 0 }
   0x3   :  { %19 = vsyncpa [#allocation12], 0 }
   0x4   :  { %20 = vsyncpa [#allocation15], 0 }
   0x5   :  { %21 = vsyncpa [#allocation4], 0  ;;  %s39_s15 = sshll.u32 %s1450_s1, 4  ;;  %s40_s15 = int_to_ptr.hbm [resolvable:$true] %s39_s15 }
   0x6   :  { %22 = vsyncpa [#allocation19], 0  ;;  %s1331_s16 = smov [#allocation5]   ;;  %s62_s20 = sshll.u32 %s1452_s3, 4  ;;  %s63_s20 = int_to_ptr.hbm [resolvable:$true] %s62_s20 }
   0x7   :  { %s41_s17 = sshll.u32 %s1331_s16, 4  ;;  %s1332_s21 = smov [#allocation8]   ;;  %s42_s17 = int_to_ptr.vmem [resolvable:$true] %s41_s17 }
   0x8   :  { %44 = dma.hbm_to_vmem [thread:$0]  %s40_s15, 128, %s42_s17, [#allocation6]  }
   0x9   :  { %s64_s22 = sshll.u32 %s1332_s21, 4  ;;  %s88_s25 = sshll.u32 %s1454_s5, 4  ;;  %s65_s22 = int_to_ptr.vmem [resolvable:$true] %s64_s22  ;;  %s89_s25 = int_to_ptr.hbm [resolvable:$true] %s88_s25 }
   0xa   :  { %s1333_s1 = smov 64   ;;  %s1334_s26 = smov 4  }
   0xb   :  { %70 = dma.hbm_to_vmem [thread:$0]  %s63_s20, 1024, %s65_s22, [#allocation9], %s1333_s1, %s1333_s1, %s1334_s26  }
   0xc   :  { %s114_s29 = sshll.u32 %s1456_s7, 4  ;;  %s1335_s3 = smov [#allocation11]   ;;  %s115_s29 = int_to_ptr.hbm [resolvable:$true] %s114_s29 }
   0xd   :  { %s90_s30 = sshll.u32 %s1335_s3, 4  ;;  %s1336_s5 = smov [#allocation14]   ;;  %s91_s30 = int_to_ptr.vmem [resolvable:$true] %s90_s30 }
   0xe   :  { %96 = dma.hbm_to_vmem [thread:$0]  %s89_s25, 1024, %s91_s30, [#allocation12], %s1333_s1, %s1333_s1, %s1334_s26  }
   0xf   :  { %s116_s11 = sshll.u32 %s1336_s5, 4  ;;  %s28_s14 = sshll.u32 %s1449_s0, 4  ;;  %s117_s11 = int_to_ptr.vmem [resolvable:$true] %s116_s11  ;;  %s29_s14 = int_to_ptr.hbm [resolvable:$true] %s28_s14 }
  0x10   :  { %122 = dma.hbm_to_vmem [thread:$0]  %s115_s29, 1024, %s117_s11, [#allocation15], %s1333_s1, %s1333_s1, %s1334_s26  }
  0x11   :  { %s49_s16 = sshll.u32 %s1451_s2, 4  ;;  %s1337_s17 = smov [#allocation2]   ;;  %s50_s16 = int_to_ptr.hbm [resolvable:$true] %s49_s16 }
  0x12   :  { %s30_s18 = sshll.u32 %s1337_s17, 4  ;;  %s1338_s19 = smov [#allocation7]   ;;  %s31_s18 = int_to_ptr.vmem [resolvable:$true] %s30_s18 }
  0x13   :  { %33 = dma.hbm_to_vmem [thread:$0]  %s29_s14, 64, %s31_s18, [#allocation3]  }
  0x14   :  { %s51_s20 = sshll.u32 %s1338_s19, 4  ;;  %s75_s0 = sshll.u32 %s1453_s4, 4  ;;  %s52_s20 = int_to_ptr.vmem [resolvable:$true] %s51_s20  ;;  %s76_s0 = int_to_ptr.hbm [resolvable:$true] %s75_s0 }
  0x15   :  { %57 = dma.hbm_to_vmem [thread:$0]  %s50_s16, 1024, %s52_s20, [#allocation6], %s1333_s1, %s1333_s1, %s1334_s26  }
  0x16   :  { %s1339_s23 = smov [#allocation10]   ;;  %s101_s27 = sshll.u32 %s1455_s6, 4  ;;  %s102_s27 = int_to_ptr.hbm [resolvable:$true] %s101_s27 }
  0x17   :  { %s77_s24 = sshll.u32 %s1339_s23, 4  ;;  %s1340_s28 = smov 128   ;;  %s78_s24 = int_to_ptr.vmem [resolvable:$true] %s77_s24 }
  0x18   :  { %s1341_s29 = smov 8   ;;  %s1342_s3 = smov [#allocation13]  }
  0x19   :  { %83 = dma.hbm_to_vmem [thread:$0]  %s76_s0, 2048, %s78_s24, [#allocation9], %s1340_s28, %s1340_s28, %s1341_s29  }
  0x1a   :  { %s103_s30 = sshll.u32 %s1342_s3, 4  ;;  %s128_s11 = sshll.u32 %s1457_s8, 4  ;;  %s104_s30 = int_to_ptr.vmem [resolvable:$true] %s103_s30  ;;  %s129_s11 = int_to_ptr.hbm [resolvable:$true] %s128_s11 }
  0x1b   :  { %109 = dma.hbm_to_vmem [thread:$0]  %s102_s27, 1024, %s104_s30, [#allocation12], %s1333_s1, %s1333_s1, %s1334_s26  }
  0x1c   :  { %s1343_s12 = smov [#allocation16]  }
  0x1d   :  { %s130_s13 = sshll.u32 %s1343_s12, 4  ;;  %s131_s13 = int_to_ptr.vmem [resolvable:$true] %s130_s13 }
  0x1e   :  { %133 = dma.hbm_to_vmem [thread:$0]  %s129_s11, 256, %s131_s13, [#allocation15]  }
  0x1f   :  { %1317 = dma.done.wait [#allocation3], 64  }
  0x20   :  { %1318 = vsyncadd [#allocation3], 4294967232 }
  0x21   :  { %1319 = dma.done.wait [#allocation6], 1152  }
  0x22   :  { %1320 = vsyncadd [#allocation6], 4294966144 }
  0x23   :  { %1321 = dma.done.wait [#allocation9], 3072  }
  0x24   :  { %1322 = vsyncadd [#allocation9], 4294964224 }
  0x25   :  { %1323 = dma.done.wait [#allocation12], 2048  }
  0x26   :  { %1324 = vsyncadd [#allocation12], 4294965248 }
  0x27   :  { %1325 = dma.done.wait [#allocation15], 1280  }
  0x28   :  { %1326 = vsyncadd [#allocation15], 4294966016  ;;  %v987_v0 = vld [vmem:[#allocation7 + $0x38] sm:$0xff]  ;;  %v986_v1 = vld [vmem:[#allocation7 + $0x30] sm:$0xff]  ;;  %s1344_s6 = smov [#allocation18]   ;;  %s737_s14 = sshll.u32 %s1459_s10, 4  ;;  %s738_s14 = int_to_ptr.hbm [resolvable:$true] %s737_s14 }
  0x29   :  { %236 = vmatpush.bf16.msra.mxu0 %v987_v0  ;;  %v995_v2 = vld [vmem:[#allocation8 + $0x38] sm:$0xff]  ;;  %v994_v3 = vld [vmem:[#allocation8 + $0x30] sm:$0xff]  ;;  %v985_v4 = vld [vmem:[#allocation7 + $0x28] sm:$0xff]  ;;  %s735_s8 = sshll.u32 %s1344_s6, 4  ;;  %s1345_s7 = smov [#allocation17]   ;;  %s736_s8 = int_to_ptr.vmem [resolvable:$true] %s735_s8 }
  0x2a   :  { %318 = vmatpush.bf16.msra.mxu1 %v995_v2  ;;  %v993_v5 = vld [vmem:[#allocation8 + $0x28] sm:$0xff]  ;;  %v984_v6 = vld [vmem:[#allocation7 + $0x20] sm:$0xff]  ;;  %v983_v8 = vld [vmem:[#allocation7 + $0x18] sm:$0xff]  ;;  %s724_s15 = sshll.u32 %s1345_s7, 4  ;;  %s726_s18 = sshll.u32 %s1458_s9, 4  ;;  %s725_s15 = int_to_ptr.vmem [resolvable:$true] %s724_s15  ;;  %s727_s18 = int_to_ptr.hbm [resolvable:$true] %s726_s18 }
  0x2b   :  { %v992_v7 = vld [vmem:[#allocation8 + $0x20] sm:$0xff]  ;;  %v991_v9 = vld [vmem:[#allocation8 + $0x18] sm:$0xff]  ;;  %v982_v10 = vld [vmem:[#allocation7 + $0x10] sm:$0xff] }
  0x2c   :  { %v990_v11 = vld [vmem:[#allocation8 + $0x10] sm:$0xff]  ;;  %v981_v12 = vld [vmem:[#allocation7 + $0x8] sm:$0xff]  ;;  %v980_v13 = vld [vmem:[#allocation7] sm:$0xff] }
  0x2d   :  { %237 = vmatpush.bf16.msra.mxu0 %v986_v1  ;;  %v170_v14 = vld [vmem:[#allocation2] sm:$0xf]  ;;  %v989_v15 = vld [vmem:[#allocation8 + $0x8] sm:$0xff]  ;;  %v988_v16 = vld [vmem:[#allocation8] sm:$0xff] }
  0x2e   :  { %319 = vmatpush.bf16.msra.mxu1 %v994_v3  ;;  %v878_v17 = vld [vmem:[#allocation10 + $0x70] sm:$0xf]  ;;  %v1011_v18 = vld [vmem:[#allocation10 + $0x74] sm:$0xf0]  ;;  %v1010_v19 = vld [vmem:[#allocation10 + $0x74] sm:$0xf] }
  0x2f   :  { %v879_v20 = vor.u32 %v1011_v18, %v878_v17  ;;  %v880_v21 = vld [vmem:[#allocation10 + $0x78] sm:$0xf0]  ;;  %v870_v22 = vld [vmem:[#allocation10 + $0x60] sm:$0xf]  ;;  %v1009_v23 = vld [vmem:[#allocation10 + $0x64] sm:$0xf0] }
  0x30   :  { %v883_v24 = vor.u32 %v1010_v19, %v880_v21  ;;  %v1008_v25 = vld [vmem:[#allocation10 + $0x64] sm:$0xf]  ;;  %v872_v26 = vld [vmem:[#allocation10 + $0x68] sm:$0xf0]  ;;  %v871_v27 = vor.u32 %v1009_v23, %v870_v22  ;;  %v862_v29 = vld [vmem:[#allocation10 + $0x50] sm:$0xf] }
  0x31   :  { %238 = vmatpush.bf16.msra.mxu0 %v985_v4  ;;  %438 = vmatpush.bf16.msra.mxu2 %v879_v20  ;;  %v875_v28 = vor.u32 %v1008_v25, %v872_v26  ;;  %v1007_v30 = vld [vmem:[#allocation10 + $0x54] sm:$0xf0]  ;;  %v1006_v31 = vld [vmem:[#allocation10 + $0x54] sm:$0xf]  ;;  %v864_v32 = vld [vmem:[#allocation10 + $0x58] sm:$0xf0] }
  0x32   :  { %320 = vmatpush.bf16.msra.mxu1 %v993_v5  ;;  %451 = vmatpush.bf16.msra.mxu3 %v883_v24  ;;  %v863_v33 = vor.u32 %v1007_v30, %v862_v29  ;;  %v867_v34 = vor.u32 %v1006_v31, %v864_v32  ;;  %v854_v35 = vld [vmem:[#allocation10 + $0x40] sm:$0xf]  ;;  %v1005_v36 = vld [vmem:[#allocation10 + $0x44] sm:$0xf0]  ;;  %v1004_v37 = vld [vmem:[#allocation10 + $0x44] sm:$0xf] }
  0x33   :  { %v856_v38 = vld [vmem:[#allocation10 + $0x48] sm:$0xf0]  ;;  %v855_v39 = vor.u32 %v1005_v36, %v854_v35  ;;  %v846_v41 = vld [vmem:[#allocation10 + $0x30] sm:$0xf]  ;;  %v1003_v42 = vld [vmem:[#allocation10 + $0x34] sm:$0xf0] }
  0x34   :  { %v859_v40 = vor.u32 %v1004_v37, %v856_v38  ;;  %v1002_v43 = vld [vmem:[#allocation10 + $0x34] sm:$0xf]  ;;  %v848_v44 = vld [vmem:[#allocation10 + $0x38] sm:$0xf0]  ;;  %v847_v45 = vor.u32 %v1003_v42, %v846_v41  ;;  %v838_v47 = vld [vmem:[#allocation10 + $0x20] sm:$0xf] }
  0x35   :  { %239 = vmatpush.bf16.msra.mxu0 %v984_v6  ;;  %439 = vmatpush.bf16.msra.mxu2 %v871_v27  ;;  %v851_v46 = vor.u32 %v1002_v43, %v848_v44  ;;  %v1001_v48 = vld [vmem:[#allocation10 + $0x24] sm:$0xf0]  ;;  %v1000_v49 = vld [vmem:[#allocation10 + $0x24] sm:$0xf]  ;;  %v840_v50 = vld [vmem:[#allocation10 + $0x28] sm:$0xf0] }
  0x36   :  { %321 = vmatpush.bf16.msra.mxu1 %v992_v7  ;;  %452 = vmatpush.bf16.msra.mxu3 %v875_v28  ;;  %v839_v51 = vor.u32 %v1001_v48, %v838_v47  ;;  %v843_v52 = vor.u32 %v1000_v49, %v840_v50  ;;  %v187_v53 = vld [vmem:[#allocation16] ss:$0 sm:$0xff]  ;;  %v830_v60 = vld [vmem:[#allocation10 + $0x10] sm:$0xf]  ;;  %v999_v61 = vld [vmem:[#allocation10 + $0x14] sm:$0xf0] }
  0x37   :  { %v998_v62 = vld [vmem:[#allocation10 + $0x14] sm:$0xf]  ;;  %v831_v63 = vor.u32 %v999_v61, %v830_v60  ;;  %v832_v0 = vld [vmem:[#allocation10 + $0x18] sm:$0xf0]  ;;  %v822_v2 = vld [vmem:[#allocation10] sm:$0xf] }
  0x38   :  { %v835_v1 = vor.u32 %v998_v62, %v832_v0  ;;  %v997_v3 = vld [vmem:[#allocation10 + $0x4] sm:$0xf0]  ;;  %v996_v4 = vld [vmem:[#allocation10 + $0x4] sm:$0xf]  ;;  %v824_v6 = vld [vmem:[#allocation10 + $0x8] sm:$0xf0] }
  0x39   :  { %240 = vmatpush.bf16.msra.mxu0 %v983_v8  ;;  %440 = vmatpush.bf16.msra.mxu2 %v863_v33  ;;  %v823_v5 = vor.u32 %v997_v3, %v822_v2  ;;  %v827_v7 = vor.u32 %v996_v4, %v824_v6  ;;  %v1019_v8 = vld [vmem:[#allocation11 + $0x38] sm:$0xff]  ;;  %v1014_v20 = vld [vmem:[#allocation11 + $0x10] sm:$0xff]  ;;  %v1013_v21 = vld [vmem:[#allocation11 + $0x8] sm:$0xff] }
  0x3a   :  { %322 = vmatpush.bf16.msra.mxu1 %v991_v9  ;;  %453 = vmatpush.bf16.msra.mxu3 %v867_v34  ;;  %v1018_v9 = vld [vmem:[#allocation11 + $0x30] sm:$0xff]  ;;  %v1015_v19 = vld [vmem:[#allocation11 + $0x18] sm:$0xff]  ;;  %v1012_v22 = vld [vmem:[#allocation11] sm:$0xff] }
  0x3b   :  { %v1027_v23 = vld [vmem:[#allocation13 + $0x38] sm:$0xff]  ;;  %v1026_v24 = vld [vmem:[#allocation13 + $0x30] sm:$0xff]  ;;  %v1025_v25 = vld [vmem:[#allocation13 + $0x28] sm:$0xff] }
  0x3c   :  { %v352_v26 = vld [vmem:[#allocation16 + $0x2] ss:$8 sm:$0x3]  ;;  %v1023_v32 = vld [vmem:[#allocation13 + $0x18] sm:$0xff]  ;;  %v1022_v36 = vld [vmem:[#allocation13 + $0x10] sm:$0xff] }
  0x3d   :  { %241 = vmatpush.bf16.msra.mxu0 %v982_v10  ;;  %441 = vmatpush.bf16.msra.mxu2 %v855_v39  ;;  %v1017_v10 = vld [vmem:[#allocation11 + $0x28] sm:$0xff]  ;;  %v1024_v27 = vld [vmem:[#allocation13 + $0x20] sm:$0xff]  ;;  %v354_v28 = vperm.slane %v352_v26, 0  ;;  %v355_v29 = vperm.slane %v352_v26, 1  ;;  %v464_v39 = vld [vmem:[#allocation5] sm:$0xff] }
  0x3e   :  { %323 = vmatpush.bf16.msra.mxu1 %v990_v11  ;;  %454 = vmatpush.bf16.msra.mxu3 %v859_v40  ;;  %v1016_v11 = vld [vmem:[#allocation11 + $0x20] sm:$0xff]  ;;  %v1021_v44 = vld [vmem:[#allocation13 + $0x8] sm:$0xff]  ;;  %v1034_v47 = vld [vmem:[#allocation14 + $0x30] sm:$0xff] }
  0x3f   :  { %v1033_v48 = vld [vmem:[#allocation14 + $0x28] sm:$0xff]  ;;  %v1032_v49 = vld [vmem:[#allocation14 + $0x20] sm:$0xff]  ;;  %v1031_v50 = vld [vmem:[#allocation14 + $0x18] sm:$0xff] }
  0x40   :  { %v1028_v60 = vld [vmem:[#allocation14] sm:$0xff] }
  0x41   :  { %242 = vmatpush.bf16.msra.mxu0 %v981_v12  ;;  %442 = vmatpush.bf16.msra.mxu2 %v847_v45  ;;  %v269_v12 = vld [vmem:[#allocation16 + $0x1] ss:$0 sm:$0xff]  ;;  %v568_v61 = vld [vmem:[#allocation16 + $0x4] ss:$0 sm:$0xff]  ;;  %v650_v4 = vld [vmem:[#allocation16 + $0x5] ss:$0 sm:$0xff] }
  0x42   :  { %324 = vmatpush.bf16.msra.mxu1 %v989_v15  ;;  %455 = vmatpush.bf16.msra.mxu3 %v851_v46  ;;  %v1020_v45 = vld [vmem:[#allocation13] sm:$0xff]  ;;  %v1035_v46 = vld [vmem:[#allocation14 + $0x38] sm:$0xff] }
  0x45   :  { %243 = vmatpush.bf16.msra.mxu0 %v980_v13  ;;  %443 = vmatpush.bf16.msra.mxu2 %v839_v51  ;;  %v1030_v51 = vld [vmem:[#allocation14 + $0x10] sm:$0xff] }
  0x46   :  { %325 = vmatpush.bf16.msra.mxu1 %v988_v16  ;;  %456 = vmatpush.bf16.msra.mxu3 %v843_v52  ;;  %v486_v52 = vld [vmem:[#allocation16 + $0x3] ss:$0 sm:$0xff] }
  0x48   :  { %244 = vmatmul.bf16.vlgmr.msra.gmra.mxu0 %v170_v14 }
  0x49   :  { %444 = vmatpush.bf16.msra.mxu2 %v831_v63  ;;  %535 = vmatpush.bf16.msrb.mxu0 %v1019_v8 }
  0x4a   :  { %457 = vmatpush.bf16.msra.mxu3 %v835_v1  ;;  %617 = vmatpush.bf16.msrb.mxu1 %v1027_v23 }
  0x4d   :  { %445 = vmatpush.bf16.msra.mxu2 %v823_v5  ;;  %536 = vmatpush.bf16.msrb.mxu0 %v1018_v9 }
  0x4e   :  { %458 = vmatpush.bf16.msra.mxu3 %v827_v7  ;;  %618 = vmatpush.bf16.msrb.mxu1 %v1026_v24 }
  0x51   :  { %537 = vmatpush.bf16.msrb.mxu0 %v1017_v10  ;;  %699 = vmatpush.bf16.msrb.mxu2 %v1035_v46 }
  0x52   :  { %619 = vmatpush.bf16.msrb.mxu1 %v1025_v25 }
  0x55   :  { %538 = vmatpush.bf16.msrb.mxu0 %v1016_v11  ;;  %700 = vmatpush.bf16.msrb.mxu2 %v1034_v47 }
  0x56   :  { %620 = vmatpush.bf16.msrb.mxu1 %v1024_v27 }
  0x59   :  { %539 = vmatpush.bf16.msrb.mxu0 %v1015_v19  ;;  %701 = vmatpush.bf16.msrb.mxu2 %v1033_v48 }
  0x5a   :  { %621 = vmatpush.bf16.msrb.mxu1 %v1023_v32 }
  0x5d   :  { %540 = vmatpush.bf16.msrb.mxu0 %v1014_v20  ;;  %702 = vmatpush.bf16.msrb.mxu2 %v1032_v49 }
  0x5e   :  { %622 = vmatpush.bf16.msrb.mxu1 %v1022_v36 }
  0x61   :  { %541 = vmatpush.bf16.msrb.mxu0 %v1013_v21  ;;  %703 = vmatpush.bf16.msrb.mxu2 %v1031_v50 }
  0x62   :  { %623 = vmatpush.bf16.msrb.mxu1 %v1021_v44 }
  0x65   :  { %542 = vmatpush.bf16.msrb.mxu0 %v1012_v22  ;;  %704 = vmatpush.bf16.msrb.mxu2 %v1030_v51 }
  0x66   :  { %624 = vmatpush.bf16.msrb.mxu1 %v1020_v45 }
  0xc5   :  { %v245_v54 = vpop.f32.mrf.mxu0 }
  0xc6   :  { %v246_v55 = vadd.f32 %v245_v54, %v187_v53 }
  0xc8   :  { %v250_v56 = vmul.f32 0.1, %v246_v55  ;;  %vm249_vm0 = vcmp.gt.f32.partialorder %v246_v55, 0.0 }
  0xca   :  { %v251_v57 = vsel %vm249_vm0, %v246_v55, %v250_v56 }
  0xcb   :  { %v252_v58 = vpack.c.bf16 %v251_v57, %v251_v57 }
  0xcd   :  { %v247_v59 = vpop.f32.mrf.mxu0  ;;  %326 = vmatmul.bf16.vlgmr.msra.gmra.mxu1 %v252_v58 }
  0xce   :  { %v1029_v59 = vld [vmem:[#allocation14 + $0x8] sm:$0xff] }
  0xcf   :  { %705 = vmatpush.bf16.msrb.mxu2 %v1029_v59 }
  0xd3   :  { %706 = vmatpush.bf16.msrb.mxu2 %v1028_v60 }
 0x14a   :  { %v327_v13 = vpop.f32.mrf.mxu1 }
 0x14b   :  { %v328_v14 = vadd.f32 %v327_v13, %v269_v12 }
 0x14d   :  { %v332_v15 = vmul.f32 0.1, %v328_v14  ;;  %vm331_vm1 = vcmp.gt.f32.partialorder %v328_v14, 0.0 }
 0x14f   :  { %v333_v16 = vsel %vm331_vm1, %v328_v14, %v332_v15 }
 0x150   :  { %v334_v17 = vpack.c.bf16 %v333_v16, %v333_v16 }
 0x152   :  { %v329_v18 = vpop.f32.mrf.mxu1  ;;  %446 = vmatmul.bf16.vlgmr.msra.gmra.mxu2 %v334_v17  ;;  %459 = vmatmul.bf16.vlgmr.msra.gmra.mxu3 %v334_v17 }
 0x1d5   :  { %v447_v30 = vpop.f32.mrf.mxu2  ;;  %v460_v31 = vpop.f32.mrf.mxu3 }
 0x1d6   :  { %v448_v33 = vadd.f32 %v447_v30, %v354_v28  ;;  %v461_v34 = vadd.f32 %v460_v31, %v355_v29 }
 0x1d8   :  { %717 = vst [vmem:[#allocation18 + $0x8] sm:$0xff] %v448_v33  ;;  %v465_v35 = vmul.f32 1.442695, %v461_v34 }
 0x1d9   :  { %718 = vst [vmem:[#allocation18 + $0x10] sm:$0xff] %v461_v34 }
 0x1da   :  { %1051 = vpow2.f32 %v465_v35 }
 0x1dd   :  { %v449_v37 = vpop.f32.mrf.mxu2  ;;  %v462_v38 = vpop.f32.mrf.mxu3 }
 0x1e0   :  { %v1052_v40 = vpop.eup %1051 }
 0x1e1   :  { %v467_v41 = vmul.f32 %v1052_v40, %v464_v39 }
 0x1e3   :  { %v468_v42 = vadd.f32 %v467_v41, %v448_v33 }
 0x1e5   :  { %v469_v43 = vpack.c.bf16 %v468_v42, %v468_v42  ;;  %716 = vst [vmem:[#allocation18] sm:$0xff] %v468_v42 }
 0x1e6   :  { %740 = dma.vmem_to_hbm [thread:$0]  %s736_s8, 384, %s738_s14, [#allocation19]  }
 0x1e7   :  { %543 = vmatmul.bf16.vlgmr.msrb.gmra.mxu0 %v469_v43 }
 0x264   :  { %v544_v53 = vpop.f32.mrf.mxu0 }
 0x265   :  { %v545_v54 = vadd.f32 %v544_v53, %v486_v52 }
 0x267   :  { %vm548_vm2 = vcmp.gt.f32.partialorder %v545_v54, 0.0  ;;  %v549_v55 = vmul.f32 0.1, %v545_v54 }
 0x269   :  { %v550_v56 = vsel %vm548_vm2, %v545_v54, %v549_v55 }
 0x26a   :  { %v551_v57 = vpack.c.bf16 %v550_v56, %v550_v56 }
 0x26c   :  { %v546_v58 = vpop.f32.mrf.mxu0  ;;  %625 = vmatmul.bf16.vlgmr.msrb.gmra.mxu1 %v551_v57 }
 0x2e9   :  { %v626_v62 = vpop.f32.mrf.mxu1 }
 0x2ea   :  { %v627_v63 = vadd.f32 %v626_v62, %v568_v61 }
 0x2ec   :  { %vm630_vm3 = vcmp.gt.f32.partialorder %v627_v63, 0.0  ;;  %v631_v0 = vmul.f32 0.1, %v627_v63 }
 0x2ee   :  { %v632_v1 = vsel %vm630_vm3, %v627_v63, %v631_v0 }
 0x2ef   :  { %v633_v2 = vpack.c.bf16 %v632_v1, %v632_v1 }
 0x2f1   :  { %v628_v3 = vpop.f32.mrf.mxu1  ;;  %707 = vmatmul.bf16.vlgmr.msrb.gmra.mxu2 %v633_v2 }
 0x374   :  { %v708_v5 = vpop.f32.mrf.mxu2 }
 0x375   :  { %v709_v6 = vadd.f32 %v708_v5, %v650_v4 }
 0x377   :  { %vm712_vm4 = vcmp.gt.f32.partialorder %v709_v6, 0.0  ;;  %v713_v7 = vmul.f32 0.1, %v709_v6 }
 0x379   :  { %v714_v8 = vsel %vm712_vm4, %v709_v6, %v713_v7 }
 0x37a   :  { %715 = vst [vmem:[#allocation17] sm:$0xff] %v714_v8 }
 0x37b   :  { %729 = dma.vmem_to_hbm [thread:$0]  %s725_s15, 128, %s727_s18, [#allocation4]  }
 0x37c   :  { %v710_v9 = vpop.f32.mrf.mxu2 }
 0x37d   :  { %1327 = dma.done.wait [#allocation4], 128  }
 0x37e   :  { %1328 = vsyncadd [#allocation4], 4294967168 }
 0x37f   :  { %1329 = dma.done.wait [#allocation19], 384  }
 0x380   :  { %1330 = vsyncadd [#allocation19], 4294966912 }
 0x381   :  { %749 = vsyncpa [#allocation3], 1 }
 0x382   :  { %750 = vsyncpa [#allocation6], 1 }
 0x383   :  { %751 = vsyncpa [#allocation9], 1 }
 0x384   :  { %752 = vsyncpa [#allocation12], 1 }
 0x385   :  { %753 = vsyncpa [#allocation15], 1 }
 0x386   :  { %754 = vsyncpa [#allocation4], 1 }
 0x387   :  { %755 = vsyncpa [#allocation19], 1 }

</bundles_post_ra>
